<compile_context>
chip_gen: v7x
topology: tpu7x:2x2x1
jax: 0.10.0
libtpu: 0.0.40
codegen_flags: <defaults>
</compile_context>

<pallas_src>
import jax
import jax.numpy as jnp
from jax.experimental import pallas as pl
from jax.experimental.pallas import tpu as pltpu


# ---------------------------------------------------------------------------
# Single-pass kernel: whole samples per grid step.
# ---------------------------------------------------------------------------
def _make_ca_kernel(hw):
    inv_hw = 1.0 / float(hw)

    def kernel(x_ref, w1t_ref, w2t_ref, o_ref):
        x = x_ref[...]                                   # (Nb, C, HW), native dtype

        # Adaptive avg / max pool to 1x1 == reduction over the lane axis.
        # f32 accumulation without a full-block f32 copy.
        avg = jnp.sum(x, axis=-1, dtype=jnp.float32) * inv_hw     # (Nb, C)
        mx = jnp.max(x, axis=-1).astype(jnp.float32)              # (Nb, C)

        w1t = w1t_ref[...]                               # (C, Ch) f32
        w2t = w2t_ref[...]                               # (Ch, C) f32

        # Bottleneck MLP: two tiny dots per stage (MXU is idle anyway) instead
        # of a concat + non-8-aligned sublane slice.
        h_avg = jnp.maximum(jnp.dot(avg, w1t, preferred_element_type=jnp.float32), 0.0)
        h_max = jnp.maximum(jnp.dot(mx, w1t, preferred_element_type=jnp.float32), 0.0)
        logits = (jnp.dot(h_avg, w2t, preferred_element_type=jnp.float32)
                  + jnp.dot(h_max, w2t, preferred_element_type=jnp.float32))

        # out = x + x*sigmoid(logits) = x * (1 + attn). f32 math, cast at store.
        scale = 1.0 + jax.nn.sigmoid(logits)             # (Nb, C) f32
        o_ref[...] = (x * scale[:, :, None]).astype(o_ref.dtype)

    return kernel


# ---------------------------------------------------------------------------
# Split path, pass 1: spatially tiled pooling + MLP -> per-(n, c) scale.
# ---------------------------------------------------------------------------
def _make_pool_mlp_kernel(hw, hwt):
    inv_hw = 1.0 / float(hw)
    ragged = (hw % hwt) != 0

    def kernel(x_ref, w1t_ref, w2t_ref, scale_ref, sum_acc, max_acc):
        s = pl.program_id(1)

        @pl.when(s == 0)
        def _():
            sum_acc[...] = jnp.zeros_like(sum_acc)
            max_acc[...] = jnp.full_like(max_acc, -jnp.inf)

        x = x_ref[...]                                   # (1, C, HWt)
        if ragged:
            # Only the trailing spatial tile reads OOB lanes; mask with a single
            # (1, 1, HWt) lane row (no full-block i32 intermediate).
            lane = jax.lax.broadcasted_iota(jnp.int32, (1, 1, x.shape[-1]), 2)
            valid = (s * hwt + lane) < hw
            x_sum = jnp.where(valid, x, 0.0)
            x_max = jnp.where(valid, x, -jnp.inf)
        else:
            x_sum = x
            x_max = x

        sum_acc[...] += jnp.sum(x_sum, axis=-1, dtype=jnp.float32)
        max_acc[...] = jnp.maximum(max_acc[...],
                                   jnp.max(x_max, axis=-1).astype(jnp.float32))

        @pl.when(s == pl.num_programs(1) - 1)
        def _():
            avg = sum_acc[...] * inv_hw                  # (1, C)
            mx = max_acc[...]                            # (1, C)
            w1t = w1t_ref[...]
            w2t = w2t_ref[...]
            h_avg = jnp.maximum(
                jnp.dot(avg, w1t, preferred_element_type=jnp.float32), 0.0)
            h_max = jnp.maximum(
                jnp.dot(mx, w1t, preferred_element_type=jnp.float32), 0.0)
            logits = (jnp.dot(h_avg, w2t, preferred_element_type=jnp.float32)
                      + jnp.dot(h_max, w2t, preferred_element_type=jnp.float32))
            scale_ref[...] = (1.0 + jax.nn.sigmoid(logits))[:, :, None]

    return kernel


# ---------------------------------------------------------------------------
# Split path, pass 2: spatially tiled apply of the per-(n, c) scale.
# ---------------------------------------------------------------------------
def _apply_kernel(x_ref, scale_ref, o_ref):
    x = x_ref[...]                                       # (1, C, HWt)
    scale = scale_ref[...]                               # (1, C, 1) f32
    o_ref[...] = (x * scale).astype(o_ref.dtype)


def _chip_budgets():
    """Generation-aware (block_bytes, vmem_limit_bytes)."""
    try:
        kind = jax.devices()[0].device_kind.lower()
    except Exception:
        kind = ""
    if "7" in kind:
        # v7x: 3.2 TB/s HBM makes per-step overhead costly, but only 64 MiB
        # physical VMEM -> medium blocks, scoped limit with headroom.
        return 5 * 1024 * 1024, 48 * 1024 * 1024
    # v5e / v6e: 128 MiB physical VMEM -> bigger blocks amortize the ~0.35us
    # per-step pipeline overhead; raise the scoped limit above the 16/32 MiB
    # defaults.
    return 8 * 1024 * 1024, 64 * 1024 * 1024


def ca_forward(x_nchw, w1, w2, *, target_block_bytes=None, vmem_limit_bytes=None,
               donate_x=False):
    """CA forward. x: (N, C, H, W); w1: (C//4, C); w2: (C, C//4) (bias-free 1x1)."""
    N, C, H, W = x_nchw.shape
    HW = H * W
    Ch = w1.shape[0]

    default_block, default_vmem = _chip_budgets()
    if target_block_bytes is None:
        target_block_bytes = default_block
    if vmem_limit_bytes is None:
        vmem_limit_bytes = default_vmem

    # (N, C, HW): spatial axis on lanes. No HBM pad/unpad passes — the last
    # block dim is the full array extent (always legal); unaligned HW just
    # costs a few masked stores on the tail lane chunk.
    x = x_nchw.reshape(N, C, HW)

    # Pre-transpose weights once so the kernel does plain (rows, C) @ (C, Ch).
    w1t = jnp.asarray(w1, jnp.float32).T     # (C, Ch)
    w2t = jnp.asarray(w2, jnp.float32).T     # (Ch, C)

    per_sample_bytes = C * HW * x.dtype.itemsize

    def _compiler(sem):
        return pltpu.CompilerParams(dimension_semantics=sem,
                                    vmem_limit_bytes=vmem_limit_bytes)

    if per_sample_bytes <= target_block_bytes:
        # ---- single-pass path: whole samples per block --------------------
        nb = max(1, min(N, target_block_bytes // per_sample_bytes))
        # Keep >= 2 grid steps when possible so the pipeline overlaps and
        # v7x's second TensorCore gets work.
        if N >= 2 and pl.cdiv(N, nb) < 2:
            nb = pl.cdiv(N, 2)
        grid_n = pl.cdiv(N, nb)   # ragged trailing batch block: OOB writes discarded

        out = pl.pallas_call(
            _make_ca_kernel(HW),
            out_shape=jax.ShapeDtypeStruct((N, C, HW), x.dtype),
            grid_spec=pltpu.PrefetchScalarGridSpec(
                num_scalar_prefetch=0,
                grid=(grid_n,),
                in_specs=[
                    pl.BlockSpec((nb, C, HW), lambda n: (n, 0, 0)),
                    pl.BlockSpec((C, Ch), lambda n: (0, 0)),
                    pl.BlockSpec((Ch, C), lambda n: (0, 0)),
                ],
                out_specs=pl.BlockSpec((nb, C, HW), lambda n: (n, 0, 0)),
            ),
            compiler_params=_compiler(("parallel",)),
            input_output_aliases=({0: 0} if donate_x else {}),
        )(x, w1t, w2t)
        return out.reshape(N, C, H, W)

    # ---- split path: a single sample is too big for one block -------------
    hwt = max(128, (target_block_bytes // (C * x.dtype.itemsize)) // 128 * 128)
    hwt = min(hwt, HW)
    grid_s = pl.cdiv(HW, hwt)

    scale = pl.pallas_call(
        _make_pool_mlp_kernel(HW, hwt),
        out_shape=jax.ShapeDtypeStruct((N, C, 1), jnp.float32),
        grid_spec=pltpu.PrefetchScalarGridSpec(
            num_scalar_prefetch=0,
            grid=(N, grid_s),
            in_specs=[
                pl.BlockSpec((1, C, hwt), lambda n, s: (n, 0, s)),
                pl.BlockSpec((C, Ch), lambda n, s: (0, 0)),
                pl.BlockSpec((Ch, C), lambda n, s: (0, 0)),
            ],
            out_specs=pl.BlockSpec((1, C, 1), lambda n, s: (n, 0, 0)),
            scratch_shapes=[pltpu.VMEM((1, C), jnp.float32),
                            pltpu.VMEM((1, C), jnp.float32)],
        ),
        compiler_params=_compiler(("parallel", "arbitrary")),
    )(x, w1t, w2t)

    out = pl.pallas_call(
        _apply_kernel,
        out_shape=jax.ShapeDtypeStruct((N, C, HW), x.dtype),
        grid_spec=pltpu.PrefetchScalarGridSpec(
            num_scalar_prefetch=0,
            grid=(N, grid_s),
            in_specs=[
                pl.BlockSpec((1, C, hwt), lambda n, s: (n, 0, s)),
                pl.BlockSpec((1, C, 1), lambda n, s: (n, 0, 0)),
            ],
            out_specs=pl.BlockSpec((1, C, hwt), lambda n, s: (n, 0, s)),
        ),
        compiler_params=_compiler(("parallel", "parallel")),
        input_output_aliases=({0: 0} if donate_x else {}),
    )(x, scale)
    return out.reshape(N, C, H, W)


def ca_reference(x, w1, w2):
    """Pure-JAX reference matching the PyTorch forward."""
    avg = jnp.mean(x, axis=(2, 3))                       # (N, C)
    mx = jnp.max(x, axis=(2, 3))                         # (N, C)

    def conv_block(v):                                   # v: (N, C)
        h = jnp.maximum(v @ w1.T, 0.0)
        return h @ w2.T

    attn = jax.nn.sigmoid(conv_block(avg) + conv_block(mx))[:, :, None, None]
    return x + x * attn


if __name__ == "__main__":
    key = jax.random.PRNGKey(0)
    k_x, k_w1, k_w2, k_x2, k_x3 = jax.random.split(key, 5)

    # ics = 8 -> bottleneck channels = 2
    N, C, H, W = 2, 8, 16, 16
    Ch = C // 4

    x = jax.random.normal(k_x, (N, C, H, W), dtype=jnp.float32)
    w1 = jax.random.normal(k_w1, (Ch, C), dtype=jnp.float32) * 0.1
    w2 = jax.random.normal(k_w2, (C, Ch), dtype=jnp.float32) * 0.1

    def check(out, ref, tag):
        assert out.shape == ref.shape, tag
        err = float(jnp.max(jnp.abs(out - ref)))
        assert err < 1e-4, (tag, err)

    # 1) aligned spatial size, single-pass path
    out = jax.block_until_ready(ca_forward(x, w1, w2))
    check(out, ca_reference(x, w1, w2), "single_pass_aligned")

    # 2) H*W not a multiple of 128: no wrapper pad, masked tail stores only
    x2 = jax.random.normal(k_x2, (N, C, 12, 12), dtype=jnp.float32)
    out2 = jax.block_until_ready(ca_forward(x2, w1, w2))
    check(out2, ca_reference(x2, w1, w2), "single_pass_unaligned")

    # 3) odd batch -> ragged trailing batch block via pl.cdiv grid
    x3 = jax.random.normal(k_x3, (3, C, H, W), dtype=jnp.float32)
    out3 = jax.block_until_ready(ca_forward(x3, w1, w2))
    check(out3, ca_reference(x3, w1, w2), "ragged_batch")

    # 4) force the spatially-tiled two-pass path (large-sample fallback)
    out4 = jax.block_until_ready(ca_forward(x, w1, w2, target_block_bytes=4096))
    check(out4, ca_reference(x, w1, w2), "split_path_aligned")

    # 5) two-pass path with a ragged trailing spatial tile (masked pooling)
    out5 = jax.block_until_ready(ca_forward(x2, w1, w2, target_block_bytes=4096))
    check(out5, ca_reference(x2, w1, w2), "split_path_unaligned")

    print("KERNEL_OK")
</pallas_src>

<mosaic_0001>
module attributes {stable_mosaic.version = 11 : i64} {
  func.func @kernel(%arg0: i32, %arg1: memref<1x8x256xf32, #tpu.memory_space<vmem>>, %arg2: memref<8x2xf32, #tpu.memory_space<vmem>>, %arg3: memref<2x8xf32, #tpu.memory_space<vmem>>, %arg4: memref<1x8x256xf32, #tpu.memory_space<vmem>>) attributes {dimension_semantics = [#tpu.dimension_semantics<parallel>], iteration_bounds = array<i64: 2>, scalar_prefetch = 0 : i64, scratch_operands = 0 : i64, tpu.core_type = #tpu.core_type<tc>, window_params = [{transform_indices = @transform_0, window_bounds = array<i64: 1, 8, 256>}, {pipeline_mode = #tpu.pipeline_mode<synchronous>, transform_indices = @transform_1, window_bounds = array<i64: 8, 2>}, {pipeline_mode = #tpu.pipeline_mode<synchronous>, transform_indices = @transform_2, window_bounds = array<i64: 2, 8>}, {transform_indices = @transform_3, window_bounds = array<i64: 1, 8, 256>}]} {
    %c0 = arith.constant 0 : index
    %c0_0 = arith.constant 0 : index
    %c0_1 = arith.constant 0 : index
    %0 = vector.load %arg1[%c0, %c0_0, %c0_1] : memref<1x8x256xf32, #tpu.memory_space<vmem>>, vector<1x8x256xf32>
    %cst = arith.constant dense<0.000000e+00> : vector<1x8xf32>
    %1 = vector.multi_reduction <add>, %0, %cst [2] : vector<1x8x256xf32> to vector<1x8xf32>
    %cst_2 = arith.constant 3.906250e-03 : f32
    %2 = vector.broadcast %cst_2 : f32 to vector<1x8xf32>
    %3 = arith.mulf %1, %2 : vector<1x8xf32>
    %cst_3 = arith.constant dense<0xFF800000> : vector<1x8xf32>
    %4 = vector.multi_reduction <maximumf>, %0, %cst_3 [2] : vector<1x8x256xf32> to vector<1x8xf32>
    %c0_4 = arith.constant 0 : index
    %c0_5 = arith.constant 0 : index
    %5 = vector.load %arg2[%c0_4, %c0_5] : memref<8x2xf32, #tpu.memory_space<vmem>>, vector<8x2xf32>
    %c0_6 = arith.constant 0 : index
    %c0_7 = arith.constant 0 : index
    %6 = vector.load %arg3[%c0_6, %c0_7] : memref<2x8xf32, #tpu.memory_space<vmem>>, vector<2x8xf32>
    %cst_8 = arith.constant dense<0.000000e+00> : vector<1x2xf32>
    %7 = tpu.matmul %3, %5, %cst_8 {dimension_numbers = #tpu.dot_dimension_numbers<[1], [0], [0], [1], [0, 0, 1, 1], [], []>} : vector<1x8xf32>, vector<8x2xf32>, vector<1x2xf32> -> vector<1x2xf32>
    %cst_9 = arith.constant 0.000000e+00 : f32
    %8 = vector.broadcast %cst_9 : f32 to vector<1x2xf32>
    %9 = arith.maximumf %7, %8 : vector<1x2xf32>
    %cst_10 = arith.constant dense<0.000000e+00> : vector<1x2xf32>
    %10 = tpu.matmul %4, %5, %cst_10 {dimension_numbers = #tpu.dot_dimension_numbers<[1], [0], [0], [1], [0, 0, 1, 1], [], []>} : vector<1x8xf32>, vector<8x2xf32>, vector<1x2xf32> -> vector<1x2xf32>
    %cst_11 = arith.constant 0.000000e+00 : f32
    %11 = vector.broadcast %cst_11 : f32 to vector<1x2xf32>
    %12 = arith.maximumf %10, %11 : vector<1x2xf32>
    %cst_12 = arith.constant dense<0.000000e+00> : vector<1x8xf32>
    %13 = tpu.matmul %9, %6, %cst_12 {dimension_numbers = #tpu.dot_dimension_numbers<[1], [0], [0], [1], [0, 0, 1, 1], [], []>} : vector<1x2xf32>, vector<2x8xf32>, vector<1x8xf32> -> vector<1x8xf32>
    %cst_13 = arith.constant dense<0.000000e+00> : vector<1x8xf32>
    %14 = tpu.matmul %12, %6, %cst_13 {dimension_numbers = #tpu.dot_dimension_numbers<[1], [0], [0], [1], [0, 0, 1, 1], [], []>} : vector<1x2xf32>, vector<2x8xf32>, vector<1x8xf32> -> vector<1x8xf32>
    %15 = arith.addf %13, %14 : vector<1x8xf32>
    %16 = arith.negf %15 : vector<1x8xf32>
    %17 = math.exp %16 : vector<1x8xf32>
    %cst_14 = arith.constant 1.000000e+00 : f32
    %18 = vector.broadcast %cst_14 : f32 to vector<1x8xf32>
    %19 = arith.addf %18, %17 : vector<1x8xf32>
    %20 = arith.divf %18, %19 : vector<1x8xf32>
    %cst_15 = arith.constant 1.000000e+00 : f32
    %21 = vector.broadcast %cst_15 : f32 to vector<1x8xf32>
    %22 = arith.addf %21, %20 : vector<1x8xf32>
    %23 = vector.shape_cast %22 : vector<1x8xf32> to vector<1x8x1xf32>
    %24 = vector.broadcast %23 : vector<1x8x1xf32> to vector<1x8x256xf32>
    %25 = arith.mulf %0, %24 : vector<1x8x256xf32>
    %c0_16 = arith.constant 0 : index
    %c0_17 = arith.constant 0 : index
    %c0_18 = arith.constant 0 : index
    %26 = vector.load %arg4[%c0_16, %c0_17, %c0_18] : memref<1x8x256xf32, #tpu.memory_space<vmem>>, vector<1x8x256xf32>
    tpu.vector_store %arg4[%c0_16, %c0_17, %c0_18], %25 {strides = array<i32>} : memref<1x8x256xf32, #tpu.memory_space<vmem>>, vector<1x8x256xf32>,
    return
  }
  func.func @transform_0(%arg0: i32) -> (i32, i32, i32) {
    %c0_i32 = arith.constant 0 : i32
    %c0_i32_0 = arith.constant 0 : i32
    %c0_i32_1 = arith.constant 0 : i32
    return %arg0, %c0_i32, %c0_i32_0 : i32, i32, i32
  }
  func.func @transform_1(%arg0: i32) -> (i32, i32) {
    %c0_i32 = arith.constant 0 : i32
    %c0_i32_0 = arith.constant 0 : i32
    %c0_i32_1 = arith.constant 0 : i32
    return %c0_i32, %c0_i32_0 : i32, i32
  }
  func.func @transform_2(%arg0: i32) -> (i32, i32) {
    %c0_i32 = arith.constant 0 : i32
    %c0_i32_0 = arith.constant 0 : i32
    %c0_i32_1 = arith.constant 0 : i32
    return %c0_i32, %c0_i32_0 : i32, i32
  }
  func.func @transform_3(%arg0: i32) -> (i32, i32, i32) {
    %c0_i32 = arith.constant 0 : i32
    %c0_i32_0 = arith.constant 0 : i32
    %c0_i32_1 = arith.constant 0 : i32
    return %arg0, %c0_i32, %c0_i32_0 : i32, i32, i32
  }
}

</mosaic_0001>

<bundles_post_ra>
// kernel: tpu_custom_call.1
= control target key start
LH: loop header
LB: loop body
LE: loop exit
PB: predicated region body
PF: predicated region fallthrough
CT: control target
= control target key end

     0   :  { %8 = vsyncpa [#allocation3], 0  ;;  %s1202_s0 = inlined_call_operand.hbm [shape: f32[2,8,256], index: 0, kind: input, shape index: {}]   ;;  %s1203_s1 = inlined_call_operand.hbm [shape: f32[8,2], index: 1, kind: input, shape index: {}]   ;;  %s1204_s2 = inlined_call_operand.hbm [shape: f32[2,8], index: 2, kind: input, shape index: {}]   ;;  %s1205_s3 = inlined_call_operand.hbm [shape: f32[2,8,256], index: 3, kind: output, shape index: {}]  }
   0x1   :  { %10 = vsyncpa [#allocation3 + $0x1], 0 }
   0x2   :  { %11 = vsyncpa [#allocation6], 0 }
   0x3   :  { %12 = vsyncpa [#allocation4], 0 }
   0x4   :  { %14 = vsyncpa [#allocation4 + $0x1], 0  ;;  %s969_s12 = smov 0   ;;  %s971_s13 = smov 0  }
   0x5   :  { %s973_s14 = smov 0   ;;  %s975_s15 = smov 0  }
   0x6 LB: > { %s990_s16 = sadd.s32 4294967295, %s941_s15   ;;  %s655_s17 = sadd.s32 4294967294, %s941_s15   ;;  %s941_s15 = sphi %s975_s15, %s1225_s15   ;;  %s937_s14 = sphi %s973_s14, %s1224_s14   ;;  %s933_s13 = sphi %s971_s13, %s1223_s13   ;;  %s929_s12 = sphi %s969_s12, %s1222_s12  }
   0x7   : > { %p40_p0 = scmp.ne.s32.totalorder %s933_s13, %s929_s12  ;;  %p1206_p1 = scmp.eq.s32.totalorder %s990_s16, 0 }
   0x8   : > { %p112_p3 = scmp.eq.s32.totalorder %s655_s17, 1  ;;  %p656_p5 = scmp.ge.s32.totalorder %s941_s15, 1 }
   0x9   : > { %p999_p4 = por %p1206_p1, %p40_p0  ;;  %p119_p7 = scmp.lt.s32.totalorder %s941_s15, 3 }
   0xa   : > { %p1004_p6 = por %p112_p3, %p40_p0  ;;  %s943_s21 = smov [#allocation5]  }
   0xb   : > { %s1209_s18 = scalar_select %p999_p4, 1, 0 }
   0xc   : > { %s1210_s19 = scalar_select %p1004_p6, 1, 0 }
   0xd   : > { %p1009_p8 = pnand %p656_p5, %p119_p7  ;;  %s132_s22 = sshll.u32 %s943_s21, 4  ;;  %s133_s22 = int_to_ptr.vmem [resolvable:$true] %s132_s22 }
   0xe   : > { %s944_s23 = smov [#allocation7]   ;;  %s1025_s26 = sadd.s32 1, %s941_s15  }
   0xf   : > { %s1211_s20 = scalar_select %p1009_p8, 1, 0 }
  0x10   : > { %p724_p10 = pneg %p1009_p8  ;;  %s143_s24 = sshll.u32 %s944_s23, 4  ;;  %s1022_s24 = int_to_ptr.vmem [resolvable:$true] %s143_s24 }
  0x11   : > { %s24_s27 = ssub.s32 %s941_s15, %s1025_s26  ;;  %s785_s30 = scalar_lea.hbm %s1203_s1, 128 }
  0x12   : > { %p1018_p11 = pnand %p724_p10, %p1206_p1  ;;  %p786_p12 = scmp.ne.s32.totalorder %s1203_s1, %s785_s30 }
  0x13   : > { %p792_p5 = scmp.lt.u32.totalorder %s785_s30, %s1203_s1 }
  0x14   : > { %p787_p13 = pneg %p1018_p11 }
  0x16   : > { %p788_p0 = pnand %p787_p13, %p786_p12 }
  0x18   : > { %p789_p3 = pneg %p788_p0 }
  0x1a   : > { %p794_p7 = pnand %p792_p5, %p789_p3 }
  0x1c   : > { %797 = shalt.err (!%p794_p7)
}
  0x1d   : > { %s798_s8 = scalar_lea.vmem %s133_s22, 128  ;;  %p806_p2 = scmp.lt.s32.totalorder %s133_s22, %s133_s22 }
  0x1e   : > { %p799_p10 = scmp.ne.s32.totalorder %s133_s22, %s798_s8  ;;  %p807_p6 = scmp.lt.s32.totalorder %s798_s8, %s798_s8 }
  0x20   : > { %p801_p9 = pnand %p799_p10, %p787_p13  ;;  %p808_p4 = por %p807_p6, %p806_p2 }
  0x22   : > { %p802_p1 = pneg %p801_p9 }
  0x24   : > { %p809_p8 = pnand %p808_p4, %p802_p1 }
  0x26   : > { %812 = shalt.err (!%p809_p8)
}
  0x27   : > { %727 = dma.hbm_to_vmem [thread:$0]  (!%p1018_p11), %s1203_s1, 128, %s133_s22, [#allocation6]  }
  0x28   : > { %s813_s21 = scalar_lea.hbm %s1204_s2, 32 }
  0x29   : > { %p814_p9 = scmp.ne.s32.totalorder %s1204_s2, %s813_s21  ;;  %p820_p4 = scmp.lt.u32.totalorder %s813_s21, %s1204_s2 }
  0x2b   : > { %p816_p2 = pnand %p814_p9, %p787_p13 }
  0x2d   : > { %p817_p1 = pneg %p816_p2 }
  0x2f   : > { %p822_p6 = pnand %p820_p4, %p817_p1 }
  0x31   : > { %825 = shalt.err (!%p822_p6)
}
  0x32   : > { %s826_s22 = scalar_lea.vmem %s1022_s24, 32  ;;  %p834_p3 = scmp.lt.s32.totalorder %s1022_s24, %s1022_s24 }
  0x33   : > { %p827_p8 = scmp.ne.s32.totalorder %s1022_s24, %s826_s22  ;;  %p835_p5 = scmp.lt.s32.totalorder %s826_s22, %s826_s22 }
  0x35   : > { %p829_p12 = pnand %p827_p8, %p787_p13  ;;  %p836_p7 = por %p835_p5, %p834_p3 }
  0x37   : > { %p830_p0 = pneg %p829_p12 }
  0x39   : > { %p837_p10 = pnand %p836_p7, %p830_p0 }
  0x3b   : > { %840 = shalt.err (!%p837_p10)
}
  0x3c   : > { %730 = dma.hbm_to_vmem [thread:$0]  (!%p1018_p11), %s1204_s2, 32, %s1022_s24, [#allocation6]  }
  0x3d   : > { %p25_p13 = scmp.eq.s32.totalorder %s24_s27, 0  ;;  %s27_s6 = sadd.s32 1, %s937_s14 }
  0x3e   : > { %p34_p9 = scmp.ne.s32.totalorder %s937_s14, %s933_s13  ;;  %p35_p2 = scmp.eq.s32.totalorder %s941_s15, 0 }
  0x3f   : > { %s1084_s25 = scalar_select %p25_p13, %s937_s14, %s27_s6  }
  0x40   : > { %p36_p1 = por %p35_p2, %p34_p9  ;;  %p1213_p4 = scmp.eq.s32.totalorder %s990_s16, 1 }
  0x41   : > { %p741_p8 = scmp.lt.s32.totalorder %s941_s15, 2  ;;  %s154_s8 = sand.u32 1, %s937_s14  }
  0x42   : > { %p1088_p6 = por %p1213_p4, %p34_p9  ;;  %s660_s9 = sshll.u32 %s154_s8, 4 }
  0x43   : > { %s680_s10 = sshll.u32 %s941_s15, 8  ;;  %s158_s27 = scalar_lea.vmem [#allocation2], %s660_s9 }
  0x44   : > { %s1098_s24 = scalar_lea.hbm %s1202_s0, %s680_s10  ;;  %s166_s21 = sshll.u32 %s158_s27, 4  ;;  %s1100_s21 = int_to_ptr.vmem [resolvable:$true] %s166_s21 }
  0x45   : > { %p1102_p11 = pnand %p741_p8, %p36_p1  ;;  %s155_s28 = scalar_lea.sflag [#allocation3], %s154_s8 }
  0x46   : > { %s841_s29 = scalar_lea.hbm %s1098_s24, 256  ;;  %s846_s4 = scalar_lea.hbm %s1202_s0, 512 }
  0x47   : > { %p842_p12 = scmp.ne.s32.totalorder %s1098_s24, %s841_s29  ;;  %p843_p0 = pneg %p1102_p11 }
  0x48   : > { %p847_p7 = scmp.lt.u32.totalorder %s1098_s24, %s1202_s0  ;;  %p848_p10 = scmp.lt.u32.totalorder %s846_s4, %s841_s29 }
  0x49   : > { %p844_p3 = pnand %p843_p0, %p842_p12  ;;  %p850_p9 = scmp.lt.u32.totalorder %s841_s29, %s1098_s24 }
  0x4a   : > { %p849_p13 = por %p848_p10, %p847_p7 }
  0x4b   : > { %p845_p5 = pneg %p844_p3 }
  0x4c   : > { %p851_p2 = por %p850_p9, %p849_p13 }
  0x4e   : > { %p852_p1 = pnand %p851_p2, %p845_p5 }
  0x50   : > { %855 = shalt.err (!%p852_p1)
}
  0x51   : > { %s856_s8 = scalar_lea.vmem %s1100_s21, 256  ;;  %s945_s9 = smov [#allocation2]  }
  0x52   : > { %p857_p4 = scmp.ne.s32.totalorder %s1100_s21, %s856_s8  ;;  %s861_s10 = sshll.u32 %s945_s9, 4  ;;  %s862_s10 = int_to_ptr.vmem [resolvable:$false] %s861_s10 }
  0x53   : > { %s863_s11 = scalar_lea.vmem %s862_s10, 512  ;;  %p864_p3 = scmp.lt.s32.totalorder %s1100_s21, %s862_s10 }
  0x54   : > { %p859_p8 = pnand %p857_p4, %p843_p0  ;;  %p865_p7 = scmp.lt.s32.totalorder %s863_s11, %s856_s8 }
  0x56   : > { %p860_p12 = pneg %p859_p8  ;;  %p866_p10 = por %p865_p7, %p864_p3 }
  0x58   : > { %p867_p13 = pnand %p866_p10, %p860_p12 }
  0x5a   : > { %870 = shalt.err (!%p867_p13)
}
  0x5b   : > { %734 = dma.hbm_to_vmem [thread:$0]  (!%p1102_p11), %s1098_s24, 256, %s1100_s21, %s155_s28  }
  0x5c   : > { %p1216_p5 = scmp.ne.s32.totalorder %s1211_s20, 0 }
  0x5d   : > { %s1134_s17 = sand.u32 (!%p1216_p5), 1, %s933_s13   ;;  %p1217_p0 = scmp.ne.s32.totalorder (!%p1216_p5), %s1209_s18, 0 }
  0x5e   : > { %175 = sbr.rel (%p1216_p5) target bundleno = 853 (0x355), region = 32  ;;  %s664_s27 = sshll.u32 (!%p1216_p5), %s1134_s17, 4 }
  0x5f   : > { %s178_s29 = scalar_lea.sflag (!%p1216_p5), [#allocation3], %s1134_s17  ;;  %s181_s30 = scalar_lea.vmem (!%p1216_p5), [#allocation2], %s664_s27 }
  0x65   : > { %916 = dma.done.wait (%p1217_p0), %s178_s29, 256  }
  0x66   : > { %918 = vsyncadd (%p1217_p0), %s178_s29, 4294967040  ;;  %p1218_p11 = scmp.eq.s32.totalorder %s990_s16, 0 }
  0x68   : > { %920 = dma.done.wait (%p1218_p11), [#allocation6], 160   ;;  %p1219_p9 = pmov %p1218_p11 }
  0x69   : > { %v212_v0 = vld [vmem:[%s181_s30] sm:$0xff]  ;;  %v213_v1 = vld [vmem:[%s181_s30 + $0x8] sm:$0xff]  ;;  %v946_v4 = vmov 0.0   ;;  %vm947_vm0 = vmmov 0   ;;  %v224_v6 = vlaneseq  ;;  %vm230_vm1 = vcmask 64512   ;;  %s681_s18 = sshll.u32 %s990_s16, 8 }
  0x6a   : > { %922 = vsyncadd (%p1219_p9), [#allocation6], 4294967136  ;;  %v214_v2 = vadd.f32 %v213_v1, %v212_v0  ;;  %v218_v3 = vmax.f32 %v212_v0, %v213_v1  ;;  %690 = vmatprep.subr.mxu1 %v946_v4  ;;  %v221_v5 = vld [vmem:[#allocation5] sm:$0xff]  ;;  %700 = vmatprep.subr.mxu0 %v946_v4  ;;  %v222_v15 = vld [vmem:[#allocation7] sm:$0x3]  ;;  %vm386_vm2 = vcmask 1041408   ;;  %s1158_s28 = scalar_lea.hbm %s1205_s3, %s681_s18 }
  0x6b   : > { %691 = vmatpush3.msra.mxu1 %v221_v5  ;;  %692 = vmatprep.mubr.msk.f32.mxu1 %vm947_vm0, %v946_v4  ;;  %v225_v7 = vand.u32 127, %v224_v6  ;;  %v227_v8 = vshrl.u32 %v224_v6, 7  ;;  %vm382_vm3 = vcmask 15360   ;;  %s211_s20 = scalar_lea.vmem [#allocation8], %s664_s27  ;;  %s552_s22 = scalar_lea.sflag [#allocation4], %s1134_s17 }
  0x6c   : > { %215 = vadd.xlane.f32.xlu0 %v214_v2  ;;  %695 = vmatprep.subr.mxu1 %v946_v4  ;;  %s566_s24 = sshll.u32 %s211_s20, 4  ;;  %s948_s4 = smov [#allocation8]   ;;  %s1160_s24 = int_to_ptr.vmem [resolvable:$true] %s566_s24 }
  0x6d   : > { %702 = vmatprep.mubr.msk.f32.mxu0 %vm947_vm0, %v946_v4  ;;  %v228_v9 = vsub.s32 %v225_v7, %v227_v8  ;;  %701 = vmatpush3.msk.msra.mxu0 %vm386_vm2, %v222_v15  ;;  %v542_v27 = vsub.s32 0, %v227_v8  ;;  %s871_s16 = scalar_lea.vmem %s1160_s24, 256  ;;  %s875_s5 = sshll.u32 %s948_s4, 4  ;;  %s876_s5 = int_to_ptr.vmem [resolvable:$false] %s875_s5 }
  0x6e   : > { %705 = vmatprep.subr.mxu0 %v946_v4  ;;  %p872_p2 = scmp.ne.s32.totalorder %s1160_s24, %s871_s16  ;;  %s877_s6 = scalar_lea.vmem %s876_s5, 512 }
  0x6f   : > { %p878_p8 = scmp.lt.s32.totalorder %s1160_s24, %s876_s5  ;;  %p879_p12 = scmp.lt.s32.totalorder %s877_s6, %s871_s16 }
  0x70   : > { %219 = vmax.xlane.f32.xlu0 %v218_v3  ;;  %p873_p1 = pnand %p872_p2, %p1088_p6 }
  0x71   : > { %p880_p3 = por %p879_p12, %p878_p8 }
  0x72   : > { %p874_p4 = pneg %p873_p1 }
  0x74   : > { %p881_p7 = pnand %p880_p3, %p874_p4 }
  0xf9   : > { %v216_v10 = vpop.xlane.xlu0 %215 }
  0xfa   : > { %v217_v11 = vmul.f32 0.00390625, %v216_v10 }
  0xfc   : > { %v229_v12 = vrot.slane %v217_v11, %v228_v9 }
  0xfd   : > { %v220_v13 = vpop.xlane.xlu0 %219 }
  0xfe   : > { %693 = vmatmul.mubr.msk.f32.vlgmr.msra.gmra.mrb[0].mxu1 %vm230_vm1, %v229_v12  ;;  %v308_v14 = vrot.slane %v220_v13, %v228_v9 }
  0xff   : > { %696 = vmatpush3.msra.mxu1 %v221_v5  ;;  %697 = vmatprep.mubr.msk.f32.mxu1 %vm947_vm0, %v946_v4 }
 0x102   : > { %698 = vmatmul.mubr.msk.f32.vlgmr.msra.gmra.mrb[2].mxu1 %vm230_vm1, %v308_v14 }
 0x1d1   : > { %v299_v16 = vpop.f32.mrb[0].mxu1 }
 0x1d2   : > { %v694_v17 = vpop.f32.mrb[1].mxu1  ;;  %v303_v21 = vmax.f32 %v299_v16, 0.0 }
 0x1d5   : > { %v377_v18 = vpop.f32.mrb[2].mxu1 }
 0x1d6   : > { %v381_v19 = vmax.f32 %v377_v18, 0.0  ;;  %v699_v20 = vpop.f32.mrb[3].mxu1 }
 0x1d8   : > { %703 = vmatmul.mubr.msk.f32.vlgmr.msra.gmra.mrb[0].mxu0 %vm382_vm3, %v381_v19 }
 0x1d9   : > { %706 = vmatpush3.msk.msra.mxu0 %vm386_vm2, %v222_v15  ;;  %707 = vmatprep.mubr.msk.f32.mxu0 %vm947_vm0, %v946_v4 }
 0x1e0   : > { %708 = vmatmul.mubr.msk.f32.vlgmr.msra.gmra.mrb[0].mxu0 %vm382_vm3, %v303_v21 }
 0x2b3   : > { %v529_v22 = vpop.f32.mrb[0].mxu0 }
 0x2b4   : > { %v674_v23 = vmul.f32 -1.442695, %v529_v22  ;;  %v709_v24 = vpop.f32.mrb[1].mxu0 }
 0x2b6   : > { %781 = vpow2.f32 %v674_v23 }
 0x2c0   : > { %v782_v25 = vpop.eup %781 }
 0x2c1   : > { %v536_v26 = vadd.f32 1.0, %v782_v25 }
 0x2c3   : > { %783 = vrcp.f32 %v536_v26 }
 0x2cd   : > { %v784_v28 = vpop.eup %783 }
 0x2ce   : > { %v539_v29 = vadd.f32 1.0, %v784_v28 }
 0x2d0   : > { %v543_v30 = vrot.slane %v539_v29, %v542_v27 }
 0x2d2   : > { %545 = vbcast.lane.b32.xlu1 %v543_v30, 256 }
 0x344   : > { %v546_v31 = vpop.permute.xlu1 %545 }
 0x345   : > { %v547_v32 = vmul.f32 %v546_v31, %v212_v0  ;;  %v548_v33 = vmul.f32 %v546_v31, %v213_v1 }
 0x347   : > { %549 = vst [vmem:[%s211_s20] sm:$0xff] %v547_v32  ;;  %550 = vst [vmem:[%s211_s20 + $0x8] sm:$0xff] %v548_v33 }
 0x348   : > { %884 = shalt.err (!%p881_p7)
}
 0x349   : > { %s885_s8 = scalar_lea.hbm %s1158_s28, 256  ;;  %s889_s11 = scalar_lea.hbm %s1205_s3, 512 }
 0x34a   : > { %p886_p10 = scmp.ne.s32.totalorder %s1158_s28, %s885_s8  ;;  %p890_p0 = scmp.lt.u32.totalorder %s1158_s28, %s1205_s3 }
 0x34b   : > { %p891_p11 = scmp.lt.u32.totalorder %s889_s11, %s885_s8  ;;  %p893_p2 = scmp.lt.u32.totalorder %s885_s8, %s1158_s28 }
 0x34c   : > { %p887_p13 = pnand %p886_p10, %p1088_p6 }
 0x34d   : > { %p892_p9 = por %p891_p11, %p890_p0 }
 0x34e   : > { %p888_p5 = pneg %p887_p13 }
 0x34f   : > { %p894_p1 = por %p893_p2, %p892_p9 }
 0x351   : > { %p895_p4 = pnand %p894_p1, %p888_p5 }
 0x353   : > { %898 = shalt.err (!%p895_p4)
}
 0x354   : > { %722 = dma.vmem_to_hbm [thread:$0]  (%p1088_p6), %s1160_s24, 256, %s1158_s28, %s552_s22  }
 0x355 PF: > { %s578_s29 = sand.u32 1, %s929_s12   ;;  %p1220_p8 = scmp.ne.s32.totalorder %s1210_s19, 0 }
 0x356   : > { %p1221_p12 = scmp.ge.s32.totalorder %s941_s15, 2  ;;  %s579_s30 = scalar_lea.sflag [#allocation4], %s578_s29 }
 0x358   : > { %p736_p3 = pnand %p1221_p12, %p1220_p8 }
 0x35a   : > { %924 = dma.done.wait (!%p736_p3), %s579_s30, 256  }
 0x35b   : > { %926 = vsyncadd (!%p736_p3), %s579_s30, 4294967040  ;;  %p17_p7 = scmp.ge.s32.totalorder %s1025_s26, 4   ;;  %s1222_s12 = smov %s933_s13 }
 0x35c   : > { %s1223_s13 = smov %s937_s14  ;;  %s1224_s14 = smov %s1084_s25 }
 0x35d   : > { %s1225_s15 = smov %s1025_s26  ;;  %19 = sbr.rel (!%p17_p7) target bundleno = 6 (0x6), region = 85 }
 0x364   :  { %584 = vsyncpa [#allocation3], 1 }
 0x365   :  { %586 = vsyncpa [#allocation3 + $0x1], 1 }
 0x366   :  { %587 = vsyncpa [#allocation6], 1 }
 0x367   :  { %588 = vsyncpa [#allocation4], 1 }
 0x368   :  { %590 = vsyncpa [#allocation4 + $0x1], 1 }

</bundles_post_ra>
